<compile_context>
chip_gen: v7x
topology: tpu7x:2x2x1
jax: 0.10.0
libtpu: 0.0.40
codegen_flags: <defaults>
</compile_context>

<pallas_src>
import functools

import jax
import jax.numpy as jnp
from jax import lax
from jax.experimental import pallas as pl
from jax.experimental.pallas import tpu as pltpu

_LANE = 128
_SUBLANE_F32 = 8
_BLOCK_BYTES = 2 * 1024 * 1024     # HBM bytes per tensor per grid step


def _round_up(x, m):
    return ((x + m - 1) // m) * m


def _cycle_l1_kernel(rows_a, rows_b, nb_a, nb_b, blk_a, blk_b,
                     a_ref, ra_ref, b_ref, rb_ref, oa_ref, ob_ref):
    p = pl.program_id(0)                       # core-split axis ("parallel")
    i = pl.program_id(1)                       # block axis     ("arbitrary")
    g = p * pl.num_programs(1) + i             # global block id for this stream

    @pl.when(i == 0)
    def _init():
        oa_ref[...] = jnp.zeros_like(oa_ref)
        ob_ref[...] = jnp.zeros_like(ob_ref)

    def _accumulate(x_ref, r_ref, out_ref, rows, blk):
        # f32 accumulation regardless of input dtype (bf16 stays bf16 in HBM).
        d = jnp.abs(x_ref[...].astype(jnp.float32)
                    - r_ref[...].astype(jnp.float32))
        # Mask rows past the true row count: the ragged last block reads
        # out-of-bounds (unspecified) data which must not contribute.
        row = g * blk + lax.broadcasted_iota(jnp.int32, (blk, _LANE), 0)
        d = jnp.where(row < rows, d, 0.0)
        # Sublane-aligned partial reduce: pure vreg adds (VALU only, no XLU).
        out_ref[...] += jnp.sum(d.reshape(-1, _SUBLANE_F32, _LANE), axis=0)

    @pl.when(g < nb_a)
    def _acc_a():
        _accumulate(a_ref, ra_ref, oa_ref, rows_a, blk_a)

    @pl.when(g < nb_b)
    def _acc_b():
        _accumulate(b_ref, rb_ref, ob_ref, rows_b, blk_b)


def _prepare_pair(x, r):
    """Flatten a tensor pair to lane-dense (rows, 128) views (native dtype)."""
    assert x.shape == r.shape, (x.shape, r.shape)
    count = int(x.size)
    assert count > 0, "empty tensors: mean is undefined"

    itemsize = max(jnp.dtype(x.dtype).itemsize, jnp.dtype(r.dtype).itemsize)
    sublane = max(_SUBLANE_F32, 32 // itemsize)        # 8 (f32), 16 (bf16), 32 (i8)
    chunk = sublane * _LANE
    padded = max(chunk, _round_up(count, chunk))

    def as_rows(t):
        flat = jnp.reshape(t, (-1,))                   # free layout bitcast
        if padded != count:
            # Only when the element count is not already sublane*128 aligned.
            # TODO(synk): fold this pad into the kernel DMA via allow_input_fusion
            # to avoid the extra HBM round-trip for misaligned sizes.
            flat = jnp.pad(flat, (0, padded - count))
        return jnp.reshape(flat, (padded // _LANE, _LANE))

    rows = padded // _LANE
    target = max(sublane, (_BLOCK_BYTES // (_LANE * itemsize)) // sublane * sublane)
    blk = min(target, rows)                            # blk | sublane, blk <= rows
    nb = pl.cdiv(rows, blk)
    block_bytes = blk * _LANE * itemsize
    return as_rows(x), as_rows(r), count, rows, blk, nb, block_bytes


def cycle_consistency_loss(input, reconstructed_input,
                           target, reconstructed_target):
    """mean(|input - reconstructed_input|) + mean(|target - reconstructed_target|)."""
    a2, ra2, count_a, rows_a, blk_a, nb_a, bytes_a = _prepare_pair(
        input, reconstructed_input)
    b2, rb2, count_b, rows_b, blk_b, nb_b, bytes_b = _prepare_pair(
        target, reconstructed_target)

    nb_max = max(nb_a, nb_b)
    n_split = 2 if nb_max >= 2 else 1        # 2 TCs on v7x; ~free on v5e/v6e
    per_core = pl.cdiv(nb_max, n_split)

    def pair_spec(blk, nb):
        def idx(p, i):
            # Clamp: grid steps past this pair's extent re-present its last
            # block (block index unchanged -> no re-DMA); the pl.when guard in
            # the kernel skips their accumulation.
            return (jnp.minimum(p * per_core + i, nb - 1), 0)
        return pl.BlockSpec((blk, _LANE), idx)

    out_spec = pl.BlockSpec((_SUBLANE_F32, _LANE), lambda p, i: (p, 0))
    out_shape = jax.ShapeDtypeStruct((n_split * _SUBLANE_F32, _LANE), jnp.float32)

    # 4 streamed tensors, double-buffered, plus headroom for compiler scratch.
    working = 4 * (bytes_a + bytes_b)
    vmem_limit = int(max(16 << 20, min(48 << 20, working + (8 << 20))))

    cost = pl.CostEstimate(
        flops=3 * (count_a + count_b),
        transcendentals=0,
        bytes_accessed=(rows_a * _LANE * (a2.dtype.itemsize + ra2.dtype.itemsize)
                        + rows_b * _LANE * (b2.dtype.itemsize + rb2.dtype.itemsize)
                        + 2 * n_split * _SUBLANE_F32 * _LANE * 4),
    )

    kernel = functools.partial(_cycle_l1_kernel,
                               rows_a, rows_b, nb_a, nb_b, blk_a, blk_b)

    out_a, out_b = pl.pallas_call(
        kernel,
        out_shape=(out_shape, out_shape),
        grid_spec=pltpu.PrefetchScalarGridSpec(
            num_scalar_prefetch=0,
            grid=(n_split, per_core),
            in_specs=[pair_spec(blk_a, nb_a), pair_spec(blk_a, nb_a),
                      pair_spec(blk_b, nb_b), pair_spec(blk_b, nb_b)],
            out_specs=[out_spec, out_spec],
        ),
        compiler_params=pltpu.CompilerParams(
            dimension_semantics=("parallel", "arbitrary"),
            vmem_limit_bytes=vmem_limit),
        cost_estimate=cost,
    )(a2, ra2, b2, rb2)

    # Tiny final reduce + true-count scaling on a few KiB of per-core partials.
    return jnp.sum(out_a) / count_a + jnp.sum(out_b) / count_b


def _reference_loss(inp, rin, tgt, rtg):
    return (jnp.mean(jnp.abs(inp.astype(jnp.float32) - rin.astype(jnp.float32)))
            + jnp.mean(jnp.abs(tgt.astype(jnp.float32) - rtg.astype(jnp.float32))))


if __name__ == "__main__":
    key = jax.random.PRNGKey(0)
    keys = jax.random.split(key, 4)

    # NCHW images: batch=2, channels=4, spatial=16x16
    img_shape = (2, 4, 16, 16)
    inp = jax.random.normal(keys[0], img_shape, jnp.float32)
    rin = jax.random.normal(keys[1], img_shape, jnp.float32)
    tgt = jax.random.normal(keys[2], img_shape, jnp.float32)
    rtg = jax.random.normal(keys[3], img_shape, jnp.float32)

    # f32 path
    got = jax.block_until_ready(cycle_consistency_loss(inp, rin, tgt, rtg))
    want = _reference_loss(inp, rin, tgt, rtg)
    assert jnp.allclose(got, want, atol=1e-5, rtol=1e-5), (got, want)

    # bf16 path (no wrapper up-cast; kernel accumulates in f32)
    got_bf16 = jax.block_until_ready(
        cycle_consistency_loss(inp.astype(jnp.bfloat16), rin.astype(jnp.bfloat16),
                               tgt.astype(jnp.bfloat16), rtg.astype(jnp.bfloat16)))
    want_bf16 = _reference_loss(inp.astype(jnp.bfloat16), rin.astype(jnp.bfloat16),
                                tgt.astype(jnp.bfloat16), rtg.astype(jnp.bfloat16))
    assert jnp.allclose(got_bf16, want_bf16, atol=1e-2, rtol=1e-2), (got_bf16, want_bf16)

    # Mismatched pair sizes exercise the per-pair block counts / clamped index maps.
    tgt_small = tgt[:1, :2]
    rtg_small = rtg[:1, :2]
    got_mix = jax.block_until_ready(
        cycle_consistency_loss(inp, rin, tgt_small, rtg_small))
    want_mix = _reference_loss(inp, rin, tgt_small, rtg_small)
    assert jnp.allclose(got_mix, want_mix, atol=1e-5, rtol=1e-5), (got_mix, want_mix)

    print("KERNEL_OK")
</pallas_src>

<mosaic_0001>
module attributes {stable_mosaic.version = 11 : i64} {
  func.func @_cycle_l1_kernel(%arg0: i32, %arg1: i32, %arg2: memref<16x128xf32, #tpu.memory_space<vmem>>, %arg3: memref<16x128xf32, #tpu.memory_space<vmem>>, %arg4: memref<16x128xf32, #tpu.memory_space<vmem>>, %arg5: memref<16x128xf32, #tpu.memory_space<vmem>>, %arg6: memref<8x128xf32, #tpu.memory_space<vmem>>, %arg7: memref<8x128xf32, #tpu.memory_space<vmem>>) attributes {dimension_semantics = [#tpu.dimension_semantics<parallel>, #tpu.dimension_semantics<arbitrary>], iteration_bounds = array<i64: 1, 1>, scalar_prefetch = 0 : i64, scratch_operands = 0 : i64, tpu.core_type = #tpu.core_type<tc>, window_params = [{transform_indices = @transform_0, window_bounds = array<i64: 16, 128>}, {transform_indices = @transform_1, window_bounds = array<i64: 16, 128>}, {transform_indices = @transform_2, window_bounds = array<i64: 16, 128>}, {transform_indices = @transform_3, window_bounds = array<i64: 16, 128>}, {transform_indices = @transform_4, window_bounds = array<i64: 8, 128>}, {transform_indices = @transform_5, window_bounds = array<i64: 8, 128>}]} {
    %c1_i32 = arith.constant 1 : i32
    %0 = arith.muli %arg0, %c1_i32 : i32
    %1 = arith.addi %0, %arg1 : i32
    %c0_i32 = arith.constant 0 : i32
    %2 = arith.cmpi eq, %arg1, %c0_i32 : i32
    %3 = arith.extui %2 : i1 to i32
    %c0_i32_0 = arith.constant 0 : i32
    %4 = arith.cmpi ne, %3, %c0_i32_0 : i32
    scf.if %4 {
      %cst = arith.constant 0.000000e+00 : f32
      %11 = vector.broadcast %cst : f32 to vector<8x128xf32>
      %c0 = arith.constant 0 : index
      %c0_5 = arith.constant 0 : index
      %12 = vector.load %arg6[%c0, %c0_5] : memref<8x128xf32, #tpu.memory_space<vmem>>, vector<8x128xf32>
      tpu.vector_store %arg6[%c0, %c0_5], %11 {strides = array<i32>} : memref<8x128xf32, #tpu.memory_space<vmem>>, vector<8x128xf32>,
      %cst_6 = arith.constant 0.000000e+00 : f32
      %13 = vector.broadcast %cst_6 : f32 to vector<8x128xf32>
      %c0_7 = arith.constant 0 : index
      %c0_8 = arith.constant 0 : index
      %14 = vector.load %arg7[%c0_7, %c0_8] : memref<8x128xf32, #tpu.memory_space<vmem>>, vector<8x128xf32>
      tpu.vector_store %arg7[%c0_7, %c0_8], %13 {strides = array<i32>} : memref<8x128xf32, #tpu.memory_space<vmem>>, vector<8x128xf32>,
    } else {
    }
    %c1_i32_1 = arith.constant 1 : i32
    %5 = arith.cmpi slt, %1, %c1_i32_1 : i32
    %6 = arith.extui %5 : i1 to i32
    %c0_i32_2 = arith.constant 0 : i32
    %7 = arith.cmpi ne, %6, %c0_i32_2 : i32
    scf.if %7 {
      %c0 = arith.constant 0 : index
      %c0_5 = arith.constant 0 : index
      %11 = vector.load %arg2[%c0, %c0_5] : memref<16x128xf32, #tpu.memory_space<vmem>>, vector<16x128xf32>
      %c0_6 = arith.constant 0 : index
      %c0_7 = arith.constant 0 : index
      %12 = vector.load %arg3[%c0_6, %c0_7] : memref<16x128xf32, #tpu.memory_space<vmem>>, vector<16x128xf32>
      %13 = arith.subf %11, %12 : vector<16x128xf32>
      %14 = math.absf %13 : vector<16x128xf32>
      %c16_i32 = arith.constant 16 : i32
      %15 = arith.muli %1, %c16_i32 : i32
      %16 = tpu.iota {dimensions = array<i32: 0>} : vector<16x128xi32>
      %17 = vector.broadcast %15 : i32 to vector<16x128xi32>
      %18 = arith.addi %17, %16 : vector<16x128xi32>
      %c16_i32_8 = arith.constant 16 : i32
      %19 = vector.broadcast %c16_i32_8 : i32 to vector<16x128xi32>
      %20 = arith.cmpi slt, %18, %19 : vector<16x128xi32>
      %cst = arith.constant 0.000000e+00 : f32
      %21 = vector.broadcast %cst : f32 to vector<16x128xf32>
      %22 = arith.select %20, %14, %21 : vector<16x128xi1>, vector<16x128xf32>
      %c0_9 = arith.constant 0 : index
      %c0_10 = arith.constant 0 : index
      %23 = vector.load %arg6[%c0_9, %c0_10] : memref<8x128xf32, #tpu.memory_space<vmem>>, vector<8x128xf32>
      %24 = vector.shape_cast %22 : vector<16x128xf32> to vector<2x8x128xf32>
      %cst_11 = arith.constant dense<0.000000e+00> : vector<8x128xf32>
      %25 = vector.multi_reduction <add>, %24, %cst_11 [0] : vector<2x8x128xf32> to vector<8x128xf32>
      %26 = arith.addf %23, %25 : vector<8x128xf32>
      %c0_12 = arith.constant 0 : index
      %c0_13 = arith.constant 0 : index
      %27 = vector.load %arg6[%c0_12, %c0_13] : memref<8x128xf32, #tpu.memory_space<vmem>>, vector<8x128xf32>
      tpu.vector_store %arg6[%c0_12, %c0_13], %26 {strides = array<i32>} : memref<8x128xf32, #tpu.memory_space<vmem>>, vector<8x128xf32>,
    } else {
    }
    %c1_i32_3 = arith.constant 1 : i32
    %8 = arith.cmpi slt, %1, %c1_i32_3 : i32
    %9 = arith.extui %8 : i1 to i32
    %c0_i32_4 = arith.constant 0 : i32
    %10 = arith.cmpi ne, %9, %c0_i32_4 : i32
    scf.if %10 {
      %c0 = arith.constant 0 : index
      %c0_5 = arith.constant 0 : index
      %11 = vector.load %arg4[%c0, %c0_5] : memref<16x128xf32, #tpu.memory_space<vmem>>, vector<16x128xf32>
      %c0_6 = arith.constant 0 : index
      %c0_7 = arith.constant 0 : index
      %12 = vector.load %arg5[%c0_6, %c0_7] : memref<16x128xf32, #tpu.memory_space<vmem>>, vector<16x128xf32>
      %13 = arith.subf %11, %12 : vector<16x128xf32>
      %14 = math.absf %13 : vector<16x128xf32>
      %c16_i32 = arith.constant 16 : i32
      %15 = arith.muli %1, %c16_i32 : i32
      %16 = tpu.iota {dimensions = array<i32: 0>} : vector<16x128xi32>
      %17 = vector.broadcast %15 : i32 to vector<16x128xi32>
      %18 = arith.addi %17, %16 : vector<16x128xi32>
      %c16_i32_8 = arith.constant 16 : i32
      %19 = vector.broadcast %c16_i32_8 : i32 to vector<16x128xi32>
      %20 = arith.cmpi slt, %18, %19 : vector<16x128xi32>
      %cst = arith.constant 0.000000e+00 : f32
      %21 = vector.broadcast %cst : f32 to vector<16x128xf32>
      %22 = arith.select %20, %14, %21 : vector<16x128xi1>, vector<16x128xf32>
      %c0_9 = arith.constant 0 : index
      %c0_10 = arith.constant 0 : index
      %23 = vector.load %arg7[%c0_9, %c0_10] : memref<8x128xf32, #tpu.memory_space<vmem>>, vector<8x128xf32>
      %24 = vector.shape_cast %22 : vector<16x128xf32> to vector<2x8x128xf32>
      %cst_11 = arith.constant dense<0.000000e+00> : vector<8x128xf32>
      %25 = vector.multi_reduction <add>, %24, %cst_11 [0] : vector<2x8x128xf32> to vector<8x128xf32>
      %26 = arith.addf %23, %25 : vector<8x128xf32>
      %c0_12 = arith.constant 0 : index
      %c0_13 = arith.constant 0 : index
      %27 = vector.load %arg7[%c0_12, %c0_13] : memref<8x128xf32, #tpu.memory_space<vmem>>, vector<8x128xf32>
      tpu.vector_store %arg7[%c0_12, %c0_13], %26 {strides = array<i32>} : memref<8x128xf32, #tpu.memory_space<vmem>>, vector<8x128xf32>,
    } else {
    }
    return
  }
  func.func @transform_0(%arg0: i32, %arg1: i32) -> (i32, i32) {
    %c1_i32 = arith.constant 1 : i32
    %0 = arith.muli %arg0, %c1_i32 : i32
    %1 = arith.addi %0, %arg1 : i32
    %c0_i32 = arith.constant 0 : i32
    %2 = arith.minsi %1, %c0_i32 : i32
    %c0_i32_0 = arith.constant 0 : i32
    %c0_i32_1 = arith.constant 0 : i32
    return %2, %c0_i32_0 : i32, i32
  }
  func.func @transform_1(%arg0: i32, %arg1: i32) -> (i32, i32) {
    %c1_i32 = arith.constant 1 : i32
    %0 = arith.muli %arg0, %c1_i32 : i32
    %1 = arith.addi %0, %arg1 : i32
    %c0_i32 = arith.constant 0 : i32
    %2 = arith.minsi %1, %c0_i32 : i32
    %c0_i32_0 = arith.constant 0 : i32
    %c0_i32_1 = arith.constant 0 : i32
    return %2, %c0_i32_0 : i32, i32
  }
  func.func @transform_2(%arg0: i32, %arg1: i32) -> (i32, i32) {
    %c1_i32 = arith.constant 1 : i32
    %0 = arith.muli %arg0, %c1_i32 : i32
    %1 = arith.addi %0, %arg1 : i32
    %c0_i32 = arith.constant 0 : i32
    %2 = arith.minsi %1, %c0_i32 : i32
    %c0_i32_0 = arith.constant 0 : i32
    %c0_i32_1 = arith.constant 0 : i32
    return %2, %c0_i32_0 : i32, i32
  }
  func.func @transform_3(%arg0: i32, %arg1: i32) -> (i32, i32) {
    %c1_i32 = arith.constant 1 : i32
    %0 = arith.muli %arg0, %c1_i32 : i32
    %1 = arith.addi %0, %arg1 : i32
    %c0_i32 = arith.constant 0 : i32
    %2 = arith.minsi %1, %c0_i32 : i32
    %c0_i32_0 = arith.constant 0 : i32
    %c0_i32_1 = arith.constant 0 : i32
    return %2, %c0_i32_0 : i32, i32
  }
  func.func @transform_4(%arg0: i32, %arg1: i32) -> (i32, i32) {
    %c0_i32 = arith.constant 0 : i32
    %c0_i32_0 = arith.constant 0 : i32
    return %arg0, %c0_i32 : i32, i32
  }
  func.func @transform_5(%arg0: i32, %arg1: i32) -> (i32, i32) {
    %c0_i32 = arith.constant 0 : i32
    %c0_i32_0 = arith.constant 0 : i32
    return %arg0, %c0_i32 : i32, i32
  }
}

</mosaic_0001>

<bundles_post_ra>
// kernel: tpu_custom_call.1
= control target key start
LH: loop header
LB: loop body
LE: loop exit
PB: predicated region body
PF: predicated region fallthrough
CT: control target
= control target key end

     0   :  { %11 = vsyncpa [#allocation3], 0  ;;  %s490_s0 = inlined_call_operand.hbm [shape: f32[16,128], index: 0, kind: input, shape index: {}]   ;;  %s491_s1 = inlined_call_operand.hbm [shape: f32[16,128], index: 1, kind: input, shape index: {}]   ;;  %s492_s2 = inlined_call_operand.hbm [shape: f32[16,128], index: 2, kind: input, shape index: {}]   ;;  %s493_s3 = inlined_call_operand.hbm [shape: f32[16,128], index: 3, kind: input, shape index: {}]   ;;  %s494_s4 = inlined_call_operand.hbm [shape: f32[8,128], index: 4, kind: output, shape index: {0}]   ;;  %s495_s5 = inlined_call_operand.hbm [shape: f32[8,128], index: 5, kind: output, shape index: {1}]  }
   0x1   :  { %12 = vsyncpa [#allocation6], 0 }
   0x2   :  { %13 = vsyncpa [#allocation9], 0 }
   0x3   :  { %14 = vsyncpa [#allocation4], 0 }
   0x4   :  { %15 = vsyncpa [#allocation12], 0  ;;  %s354_s18 = smov [#allocation5]   ;;  %s355_s20 = smov [#allocation2]  }
   0x5   :  { %s45_s19 = sshll.u32 %s354_s18, 4  ;;  %s27_s21 = sshll.u32 %s355_s20, 4  ;;  %s46_s19 = int_to_ptr.vmem [resolvable:$true] %s45_s19  ;;  %s392_s21 = int_to_ptr.vmem [resolvable:$true] %s27_s21 }
   0x6   :  { %s212_s24 = scalar_lea.hbm %s491_s1, 256 }
   0x7   :  { %p213_p0 = scmp.ne.s32.totalorder %s491_s1, %s212_s24  ;;  %p216_p1 = scmp.lt.u32.totalorder %s212_s24, %s491_s1 }
   0x9   :  { %p218_p2 = pnand %p216_p1, %p213_p0 }
   0xb   :  { %221 = shalt.err (!%p218_p2)
}
   0xc   :  { %s222_s29 = scalar_lea.vmem %s46_s19, 256  ;;  %p227_p4 = scmp.lt.s32.totalorder %s46_s19, %s46_s19 }
   0xd   :  { %p223_p3 = scmp.ne.s32.totalorder %s46_s19, %s222_s29  ;;  %p228_p5 = scmp.lt.s32.totalorder %s222_s29, %s222_s29 }
   0xf   :  { %p229_p6 = por %p228_p5, %p227_p4 }
  0x11   :  { %p230_p7 = pnand %p229_p6, %p223_p3 }
  0x13   :  { %233 = shalt.err (!%p230_p7)
}
  0x14   :  { %s356_s30 = smov 128   ;;  %s357_s6 = smov 8  }
  0x15   :  { %51 = dma.hbm_to_vmem [thread:$0]  %s491_s1, 256, %s46_s19, [#allocation6], %s356_s30, %s356_s30, %s357_s6  }
  0x16   :  { %s234_s11 = scalar_lea.hbm %s490_s0, 256 }
  0x17   :  { %p235_p8 = scmp.ne.s32.totalorder %s490_s0, %s234_s11  ;;  %p238_p9 = scmp.lt.u32.totalorder %s234_s11, %s490_s0 }
  0x19   :  { %p240_p10 = pnand %p238_p9, %p235_p8 }
  0x1b   :  { %243 = shalt.err (!%p240_p10)
}
  0x1c   :  { %s244_s16 = scalar_lea.vmem %s392_s21, 256  ;;  %p249_p12 = scmp.lt.s32.totalorder %s392_s21, %s392_s21 }
  0x1d   :  { %p245_p11 = scmp.ne.s32.totalorder %s392_s21, %s244_s16  ;;  %p250_p13 = scmp.lt.s32.totalorder %s244_s16, %s244_s16 }
  0x1f   :  { %p251_p0 = por %p250_p13, %p249_p12 }
  0x21   :  { %p252_p1 = pnand %p251_p0, %p245_p11 }
  0x23   :  { %255 = shalt.err (!%p252_p1)
}
  0x24   :  { %33 = dma.hbm_to_vmem [thread:$0]  %s490_s0, 256, %s392_s21, [#allocation3], %s356_s30, %s356_s30, %s357_s6  }
  0x25   :  { %s358_s18 = smov [#allocation7]   ;;  %s359_s20 = smov [#allocation8]  }
  0x26   :  { %s63_s19 = sshll.u32 %s358_s18, 4  ;;  %s81_s22 = sshll.u32 %s359_s20, 4  ;;  %s64_s19 = int_to_ptr.vmem [resolvable:$true] %s63_s19  ;;  %s429_s22 = int_to_ptr.vmem [resolvable:$true] %s81_s22 }
  0x27   :  { %s256_s25 = scalar_lea.hbm %s492_s2, 256 }
  0x28   :  { %p257_p2 = scmp.ne.s32.totalorder %s492_s2, %s256_s25  ;;  %p260_p3 = scmp.lt.u32.totalorder %s256_s25, %s492_s2 }
  0x2a   :  { %p262_p4 = pnand %p260_p3, %p257_p2 }
  0x2c   :  { %265 = shalt.err (!%p262_p4)
}
  0x2d   :  { %s266_s0 = scalar_lea.vmem %s64_s19, 256  ;;  %p271_p6 = scmp.lt.s32.totalorder %s64_s19, %s64_s19 }
  0x2e   :  { %p267_p5 = scmp.ne.s32.totalorder %s64_s19, %s266_s0  ;;  %p272_p7 = scmp.lt.s32.totalorder %s266_s0, %s266_s0 }
  0x30   :  { %p273_p8 = por %p272_p7, %p271_p6 }
  0x32   :  { %p274_p9 = pnand %p273_p8, %p267_p5 }
  0x34   :  { %277 = shalt.err (!%p274_p9)
}
  0x35   :  { %69 = dma.hbm_to_vmem [thread:$0]  %s492_s2, 256, %s64_s19, [#allocation6], %s356_s30, %s356_s30, %s357_s6  }
  0x36   :  { %s278_s10 = scalar_lea.hbm %s493_s3, 256 }
  0x37   :  { %p279_p10 = scmp.ne.s32.totalorder %s493_s3, %s278_s10  ;;  %p282_p11 = scmp.lt.u32.totalorder %s278_s10, %s493_s3 }
  0x39   :  { %p284_p12 = pnand %p282_p11, %p279_p10 }
  0x3b   :  { %287 = shalt.err (!%p284_p12)
}
  0x3c   :  { %s288_s15 = scalar_lea.vmem %s429_s22, 256  ;;  %p293_p0 = scmp.lt.s32.totalorder %s429_s22, %s429_s22 }
  0x3d   :  { %p289_p13 = scmp.ne.s32.totalorder %s429_s22, %s288_s15  ;;  %p294_p1 = scmp.lt.s32.totalorder %s288_s15, %s288_s15 }
  0x3f   :  { %p295_p2 = por %p294_p1, %p293_p0 }
  0x41   :  { %p296_p3 = pnand %p295_p2, %p289_p13 }
  0x43   :  { %299 = shalt.err (!%p296_p3)
}
  0x44   :  { %87 = dma.hbm_to_vmem [thread:$0]  %s493_s3, 256, %s429_s22, [#allocation9], %s356_s30, %s356_s30, %s357_s6  }
  0x45   :  { %344 = dma.done.wait [#allocation3], 256  }
  0x46   :  { %345 = vsyncadd [#allocation3], 4294967040 }
  0x47   :  { %346 = dma.done.wait [#allocation6], 512  }
  0x48   :  { %347 = vsyncadd [#allocation6], 4294966784 }
  0x49   :  { %348 = dma.done.wait [#allocation9], 256  }
  0x4a   :  { %349 = vsyncadd [#allocation9], 4294967040  ;;  %v127_v0 = vld [vmem:[#allocation2] sm:$0xff]  ;;  %v128_v1 = vld [vmem:[#allocation2 + $0x8] sm:$0xff]  ;;  %s360_s3 = smov [#allocation10]   ;;  %s361_s6 = smov [#allocation11]  }
  0x4b   :  { %v129_v2 = vld [vmem:[#allocation5] sm:$0xff]  ;;  %v130_v3 = vld [vmem:[#allocation5 + $0x8] sm:$0xff]  ;;  %v150_v5 = vld [vmem:[#allocation7] sm:$0xff]  ;;  %s170_s30 = sshll.u32 %s360_s3, 4  ;;  %s180_s1 = sshll.u32 %s361_s6, 4  ;;  %s171_s30 = int_to_ptr.vmem [resolvable:$true] %s170_s30  ;;  %s181_s1 = int_to_ptr.vmem [resolvable:$true] %s180_s1 }
  0x4c   :  { %v131_v4 = vsub.f32 %v127_v0, %v129_v2  ;;  %v151_v6 = vld [vmem:[#allocation7 + $0x8] sm:$0xff]  ;;  %v132_v7 = vsub.f32 %v128_v1, %v130_v3  ;;  %v152_v8 = vld [vmem:[#allocation8] sm:$0xff]  ;;  %v153_v9 = vld [vmem:[#allocation8 + $0x8] sm:$0xff]  ;;  %s300_s17 = scalar_lea.vmem %s171_s30, 128  ;;  %p305_p5 = scmp.lt.s32.totalorder %s171_s30, %s171_s30 }
  0x4d   :  { %v154_v11 = vsub.f32 %v150_v5, %v152_v8  ;;  %v155_v12 = vsub.f32 %v151_v6, %v153_v9  ;;  %p301_p4 = scmp.ne.s32.totalorder %s171_s30, %s300_s17  ;;  %p306_p6 = scmp.lt.s32.totalorder %s300_s17, %s300_s17 }
  0x4e   :  { %v133_v10 = vand.u32 2147483647, %v131_v4  ;;  %v134_v13 = vand.u32 2147483647, %v132_v7 }
  0x4f   :  { %v156_v14 = vand.u32 2147483647, %v154_v11  ;;  %v157_v15 = vand.u32 2147483647, %v155_v12  ;;  %p307_p7 = por %p306_p6, %p305_p5 }
  0x50   :  { %v147_v16 = vadd.f32 %v134_v13, %v133_v10 }
  0x51   :  { %v161_v17 = vadd.f32 %v157_v15, %v156_v14  ;;  %p308_p8 = pnand %p307_p7, %p301_p4 }
  0x52   :  { %149 = vst [vmem:[#allocation10] sm:$0xff] %v147_v16 }
  0x53   :  { %163 = vst [vmem:[#allocation11] sm:$0xff] %v161_v17 }
  0x54   :  { %311 = shalt.err (!%p308_p8)
}
  0x55   :  { %s312_s20 = scalar_lea.hbm %s494_s4, 128 }
  0x56   :  { %p313_p9 = scmp.ne.s32.totalorder %s494_s4, %s312_s20  ;;  %p316_p10 = scmp.lt.u32.totalorder %s312_s20, %s494_s4 }
  0x58   :  { %p318_p11 = pnand %p316_p10, %p313_p9 }
  0x5a   :  { %321 = shalt.err (!%p318_p11)
}
  0x5b   :  { %173 = dma.vmem_to_hbm [thread:$0]  %s171_s30, 128, %s494_s4, [#allocation4]  }
  0x5c   :  { %s322_s28 = scalar_lea.vmem %s181_s1, 128  ;;  %p327_p13 = scmp.lt.s32.totalorder %s181_s1, %s181_s1 }
  0x5d   :  { %p323_p12 = scmp.ne.s32.totalorder %s181_s1, %s322_s28  ;;  %p328_p0 = scmp.lt.s32.totalorder %s322_s28, %s322_s28 }
  0x5f   :  { %p329_p1 = por %p328_p0, %p327_p13 }
  0x61   :  { %p330_p2 = pnand %p329_p1, %p323_p12 }
  0x63   :  { %333 = shalt.err (!%p330_p2)
}
  0x64   :  { %s334_s21 = scalar_lea.hbm %s495_s5, 128 }
  0x65   :  { %p335_p3 = scmp.ne.s32.totalorder %s495_s5, %s334_s21  ;;  %p338_p4 = scmp.lt.u32.totalorder %s334_s21, %s495_s5 }
  0x67   :  { %p340_p5 = pnand %p338_p4, %p335_p3 }
  0x69   :  { %343 = shalt.err (!%p340_p5)
}
  0x6a   :  { %183 = dma.vmem_to_hbm [thread:$0]  %s181_s1, 128, %s495_s5, [#allocation12]  }
  0x6b   :  { %350 = dma.done.wait [#allocation4], 128  }
  0x6c   :  { %351 = vsyncadd [#allocation4], 4294967168 }
  0x6d   :  { %352 = dma.done.wait [#allocation12], 128  }
  0x6e   :  { %353 = vsyncadd [#allocation12], 4294967168 }
  0x6f   :  { %190 = vsyncpa [#allocation3], 1 }
  0x70   :  { %191 = vsyncpa [#allocation6], 1 }
  0x71   :  { %192 = vsyncpa [#allocation9], 1 }
  0x72   :  { %193 = vsyncpa [#allocation4], 1 }
  0x73   :  { %194 = vsyncpa [#allocation12], 1 }

</bundles_post_ra>
